<compile_context>
chip_gen: v6e
topology: v6e:2x2x1
jax: 0.10.0
libtpu: 0.0.40
codegen_flags: <defaults>
</compile_context>

<pallas_src>
import jax
import jax.numpy as jnp
from jax.experimental import pallas as pl
from jax.experimental.pallas import tpu as pltpu

NUM_MODELS = 3
HIDDEN = 768
NUM_LABELS = 3


def _round_up(x, m):
    return ((x + m - 1) // m) * m


def _ensemble_head_kernel(emb_ref, w_ref, b_ref, labels_ref, logits_ref, perex_ref):
    # emb_ref:    [M, TB, H] native dtype (batch tile, auto double-buffered)
    # w_ref:      [H, C] pre-scaled by 1/M, same dtype as emb (resident)
    # b_ref:      [1, C] f32 (resident)
    # labels_ref: [TB, 1] i32
    # logits_ref: [TB, C] f32 (out)
    # perex_ref:  [TB, 1] f32 (out) per-example CE loss
    w = w_ref[...]
    # Ensemble mean folded into the MXU: sum_m emb[m] @ (W/M), f32 accumulation.
    acc = jnp.dot(emb_ref[0], w, preferred_element_type=jnp.float32)
    for m in range(1, NUM_MODELS):
        acc = acc + jnp.dot(emb_ref[m], w, preferred_element_type=jnp.float32)
    logits = acc + b_ref[...]                                         # [TB, C]
    logits_ref[...] = logits

    # Per-example cross-entropy: lse - z[label].
    mx = jnp.max(logits, axis=-1, keepdims=True)                      # [TB, 1]
    z = logits - mx                                                   # [TB, C]
    lse = jnp.log(jnp.sum(jnp.exp(z), axis=-1, keepdims=True))        # [TB, 1]
    cls_ids = jax.lax.broadcasted_iota(jnp.int32, logits.shape, 1)    # [TB, C]
    onehot = (cls_ids == labels_ref[...]).astype(jnp.float32)         # [TB, C]
    picked = jnp.sum(z * onehot, axis=-1, keepdims=True)              # [TB, 1]
    perex_ref[...] = lse - picked


def ensemble_head(embeddings, w, b, labels, *, block_b=1024):
    """embeddings: [M, B, H] (f32 or bf16); w: [H, C]; b: [1, C]; labels: [B] int.

    Returns (logits [B, C] f32, mean cross-entropy loss scalar).
    """
    M, B, H = embeddings.shape
    assert M == NUM_MODELS and H == HIDDEN
    C = NUM_LABELS

    # Fold the 1/M mean into the (tiny) classifier weight once, outside the call,
    # and match its dtype to the embeddings so the MXU sees a uniform-dtype dot.
    w_scaled = (w.astype(jnp.float32) * (1.0 / NUM_MODELS)).astype(embeddings.dtype)
    b_row = b.reshape(1, C).astype(jnp.float32)
    labels_col = labels.reshape(B, 1).astype(jnp.int32)

    # Batch tile: multiple of 16 (covers bf16 sublane packing), capped so the grid
    # has >=2 blocks whenever B allows it (keeps both v7x TensorCores busy).
    tb = min(block_b, _round_up(pl.cdiv(B, 2), 16))
    grid = (pl.cdiv(B, tb),)

    emb_bytes = M * B * H * embeddings.dtype.itemsize
    ce = pl.CostEstimate(
        flops=2 * M * B * H * C,
        transcendentals=B * C,
        bytes_accessed=emb_bytes + B * (C + 2) * 4 + H * C * embeddings.dtype.itemsize,
    )

    logits, perex = pl.pallas_call(
        _ensemble_head_kernel,
        out_shape=(
            jax.ShapeDtypeStruct((B, C), jnp.float32),   # logits
            jax.ShapeDtypeStruct((B, 1), jnp.float32),   # per-example CE
        ),
        grid=grid,
        in_specs=[
            pl.BlockSpec((NUM_MODELS, tb, HIDDEN), lambda i: (0, i, 0)),  # streamed
            pl.BlockSpec((HIDDEN, C), lambda i: (0, 0)),                  # resident W/M
            pl.BlockSpec((1, C), lambda i: (0, 0)),                       # resident b
            pl.BlockSpec((tb, 1), lambda i: (i, 0)),                      # labels tile
        ],
        out_specs=(
            pl.BlockSpec((tb, C), lambda i: (i, 0)),
            pl.BlockSpec((tb, 1), lambda i: (i, 0)),
        ),
        compiler_params=pltpu.CompilerParams(
            dimension_semantics=("parallel",),        # shard batch blocks over TCs
            vmem_limit_bytes=40 * 1024 * 1024,        # fits f32 TB=1024 double-buffer
        ),
        cost_estimate=ce,
    )(embeddings, w_scaled, b_row, labels_col)

    # Ragged tail blocks: OOB stores are masked, so every row of logits/perex is
    # valid. CrossEntropyLoss default reduction = mean over the true batch.
    loss = jnp.mean(perex[:, 0])
    return logits, loss


def standin_cls_embedding(table, input_ids):
    # TODO(synk): the three BERT encoders in model_list are external modules; stand
    # in with a deterministic embedding-table encoder producing each CLS vector.
    tok = table[input_ids]                    # [B, S, H]
    return jnp.tanh(jnp.mean(tok, axis=1))    # [B, H]


if __name__ == "__main__":
    key = jax.random.PRNGKey(0)
    B, S, V = 2, 8, 64
    keys = jax.random.split(key, 4 + NUM_MODELS)
    k_ids, k_lab, k_w, k_b = keys[0], keys[1], keys[2], keys[3]
    k_tabs = keys[4:]

    input_ids = jax.random.randint(k_ids, (B, S), 0, V, dtype=jnp.int32)
    labels = jax.random.randint(k_lab, (B,), 0, NUM_LABELS, dtype=jnp.int32)

    # Classifier = nn.Linear(768, 3): xavier-uniform weight, zero bias.
    # TODO(synk): optional loss_weights (weighted CE) not implemented; module default is unweighted.
    limit = (6.0 / (HIDDEN + NUM_LABELS)) ** 0.5
    w = jax.random.uniform(k_w, (HIDDEN, NUM_LABELS), jnp.float32, -limit, limit)
    b = jnp.zeros((1, NUM_LABELS), jnp.float32)

    # Deterministic per-model embedding tables (stand-ins for the 3 BERTs);
    # mirrors `embeddings[idx] = model(...)[0][:, 0, :]`.
    tables = [jax.random.normal(k, (V, HIDDEN), jnp.float32) * 0.02 for k in k_tabs]
    embeddings = jnp.stack(
        [standin_cls_embedding(t, input_ids) for t in tables], axis=0
    )  # [3, B, 768] f32 (pass bf16 here if the encoder emits bf16)

    logits, loss = ensemble_head(embeddings, w, b, labels)
    jax.block_until_ready((logits, loss))

    # Pure-JAX reference for a sanity check.
    pooled = jnp.mean(embeddings, axis=0)
    ref_logits = pooled @ w + b
    ref_lse = jax.nn.logsumexp(ref_logits, axis=-1)
    ref_pick = jnp.take_along_axis(ref_logits, labels[:, None], axis=-1)[:, 0]
    ref_loss = jnp.mean(ref_lse - ref_pick)
    assert jnp.allclose(logits, ref_logits, rtol=1e-2, atol=1e-4)
    assert jnp.allclose(loss, ref_loss, rtol=1e-2, atol=1e-4)

    print("KERNEL_OK")
</pallas_src>

<mosaic_0001>
module attributes {stable_mosaic.version = 11 : i64} {
  func.func @_ensemble_head_kernel(%arg0: i32, %arg1: memref<3x16x768xf32, #tpu.memory_space<vmem>>, %arg2: memref<768x3xf32, #tpu.memory_space<vmem>>, %arg3: memref<1x3xf32, #tpu.memory_space<vmem>>, %arg4: memref<16x1xi32, #tpu.memory_space<vmem>>, %arg5: memref<16x3xf32, #tpu.memory_space<vmem>>, %arg6: memref<16x1xf32, #tpu.memory_space<vmem>>) attributes {dimension_semantics = [#tpu.dimension_semantics<parallel>], iteration_bounds = array<i64: 1>, scalar_prefetch = 0 : i64, scratch_operands = 0 : i64, tpu.core_type = #tpu.core_type<tc>, window_params = [{transform_indices = @transform_0, window_bounds = array<i64: 3, 16, 768>}, {pipeline_mode = #tpu.pipeline_mode<synchronous>, transform_indices = @transform_1, window_bounds = array<i64: 768, 3>}, {pipeline_mode = #tpu.pipeline_mode<synchronous>, transform_indices = @transform_2, window_bounds = array<i64: 1, 3>}, {transform_indices = @transform_3, window_bounds = array<i64: 16, 1>}, {transform_indices = @transform_4, window_bounds = array<i64: 16, 3>}, {transform_indices = @transform_5, window_bounds = array<i64: 16, 1>}]} {
    %c0 = arith.constant 0 : index
    %c0_0 = arith.constant 0 : index
    %0 = vector.load %arg2[%c0, %c0_0] : memref<768x3xf32, #tpu.memory_space<vmem>>, vector<768x3xf32>
    %c0_1 = arith.constant 0 : index
    %c0_2 = arith.constant 0 : index
    %c0_3 = arith.constant 0 : index
    %1 = vector.load %arg1[%c0_1, %c0_2, %c0_3] : memref<3x16x768xf32, #tpu.memory_space<vmem>>, vector<1x16x768xf32>
    %2 = vector.shape_cast %1 : vector<1x16x768xf32> to vector<16x768xf32>
    %cst = arith.constant dense<0.000000e+00> : vector<16x3xf32>
    %3 = tpu.matmul %2, %0, %cst {dimension_numbers = #tpu.dot_dimension_numbers<[1], [0], [0], [1], [0, 0, 1, 1], [], []>} : vector<16x768xf32>, vector<768x3xf32>, vector<16x3xf32> -> vector<16x3xf32>
    %c1 = arith.constant 1 : index
    %c0_4 = arith.constant 0 : index
    %c0_5 = arith.constant 0 : index
    %4 = vector.load %arg1[%c1, %c0_4, %c0_5] : memref<3x16x768xf32, #tpu.memory_space<vmem>>, vector<1x16x768xf32>
    %5 = vector.shape_cast %4 : vector<1x16x768xf32> to vector<16x768xf32>
    %cst_6 = arith.constant dense<0.000000e+00> : vector<16x3xf32>
    %6 = tpu.matmul %5, %0, %cst_6 {dimension_numbers = #tpu.dot_dimension_numbers<[1], [0], [0], [1], [0, 0, 1, 1], [], []>} : vector<16x768xf32>, vector<768x3xf32>, vector<16x3xf32> -> vector<16x3xf32>
    %7 = arith.addf %3, %6 : vector<16x3xf32>
    %c2 = arith.constant 2 : index
    %c0_7 = arith.constant 0 : index
    %c0_8 = arith.constant 0 : index
    %8 = vector.load %arg1[%c2, %c0_7, %c0_8] : memref<3x16x768xf32, #tpu.memory_space<vmem>>, vector<1x16x768xf32>
    %9 = vector.shape_cast %8 : vector<1x16x768xf32> to vector<16x768xf32>
    %cst_9 = arith.constant dense<0.000000e+00> : vector<16x3xf32>
    %10 = tpu.matmul %9, %0, %cst_9 {dimension_numbers = #tpu.dot_dimension_numbers<[1], [0], [0], [1], [0, 0, 1, 1], [], []>} : vector<16x768xf32>, vector<768x3xf32>, vector<16x3xf32> -> vector<16x3xf32>
    %11 = arith.addf %7, %10 : vector<16x3xf32>
    %c0_10 = arith.constant 0 : index
    %c0_11 = arith.constant 0 : index
    %12 = vector.load %arg3[%c0_10, %c0_11] : memref<1x3xf32, #tpu.memory_space<vmem>>, vector<1x3xf32>
    %13 = vector.broadcast %12 : vector<1x3xf32> to vector<16x3xf32>
    %14 = arith.addf %11, %13 : vector<16x3xf32>
    %c0_12 = arith.constant 0 : index
    %c0_13 = arith.constant 0 : index
    %15 = vector.load %arg5[%c0_12, %c0_13] : memref<16x3xf32, #tpu.memory_space<vmem>>, vector<16x3xf32>
    tpu.vector_store %arg5[%c0_12, %c0_13], %14 {strides = array<i32>} : memref<16x3xf32, #tpu.memory_space<vmem>>, vector<16x3xf32>,
    %cst_14 = arith.constant dense<0xFF800000> : vector<16xf32>
    %16 = vector.multi_reduction <maximumf>, %14, %cst_14 [1] : vector<16x3xf32> to vector<16xf32>
    %17 = vector.shape_cast %16 : vector<16xf32> to vector<16x1xf32>
    %18 = vector.broadcast %17 : vector<16x1xf32> to vector<16x3xf32>
    %19 = arith.subf %14, %18 : vector<16x3xf32>
    %20 = math.exp %19 : vector<16x3xf32>
    %cst_15 = arith.constant dense<0.000000e+00> : vector<16xf32>
    %21 = vector.multi_reduction <add>, %20, %cst_15 [1] : vector<16x3xf32> to vector<16xf32>
    %22 = vector.shape_cast %21 : vector<16xf32> to vector<16x1xf32>
    %23 = math.log %22 : vector<16x1xf32>
    %24 = tpu.iota {dimensions = array<i32: 1>} : vector<16x3xi32>
    %c0_16 = arith.constant 0 : index
    %c0_17 = arith.constant 0 : index
    %25 = vector.load %arg4[%c0_16, %c0_17] : memref<16x1xi32, #tpu.memory_space<vmem>>, vector<16x1xi32>
    %26 = vector.broadcast %25 : vector<16x1xi32> to vector<16x3xi32>
    %27 = arith.cmpi eq, %24, %26 : vector<16x3xi32>
    %28 = arith.extui %27 : vector<16x3xi1> to vector<16x3xi32>
    %29 = arith.sitofp %28 : vector<16x3xi32> to vector<16x3xf32>
    %30 = arith.mulf %19, %29 : vector<16x3xf32>
    %cst_18 = arith.constant dense<0.000000e+00> : vector<16xf32>
    %31 = vector.multi_reduction <add>, %30, %cst_18 [1] : vector<16x3xf32> to vector<16xf32>
    %32 = vector.shape_cast %31 : vector<16xf32> to vector<16x1xf32>
    %33 = arith.subf %23, %32 : vector<16x1xf32>
    %c0_19 = arith.constant 0 : index
    %c0_20 = arith.constant 0 : index
    %34 = vector.load %arg6[%c0_19, %c0_20] : memref<16x1xf32, #tpu.memory_space<vmem>>, vector<16x1xf32>
    tpu.vector_store %arg6[%c0_19, %c0_20], %33 {strides = array<i32>} : memref<16x1xf32, #tpu.memory_space<vmem>>, vector<16x1xf32>,
    return
  }
  func.func @transform_0(%arg0: i32) -> (i32, i32, i32) {
    %c0_i32 = arith.constant 0 : i32
    %c0_i32_0 = arith.constant 0 : i32
    %c0_i32_1 = arith.constant 0 : i32
    return %c0_i32, %arg0, %c0_i32_0 : i32, i32, i32
  }
  func.func @transform_1(%arg0: i32) -> (i32, i32) {
    %c0_i32 = arith.constant 0 : i32
    %c0_i32_0 = arith.constant 0 : i32
    %c0_i32_1 = arith.constant 0 : i32
    return %c0_i32, %c0_i32_0 : i32, i32
  }
  func.func @transform_2(%arg0: i32) -> (i32, i32) {
    %c0_i32 = arith.constant 0 : i32
    %c0_i32_0 = arith.constant 0 : i32
    %c0_i32_1 = arith.constant 0 : i32
    return %c0_i32, %c0_i32_0 : i32, i32
  }
  func.func @transform_3(%arg0: i32) -> (i32, i32) {
    %c0_i32 = arith.constant 0 : i32
    %c0_i32_0 = arith.constant 0 : i32
    return %arg0, %c0_i32 : i32, i32
  }
  func.func @transform_4(%arg0: i32) -> (i32, i32) {
    %c0_i32 = arith.constant 0 : i32
    %c0_i32_0 = arith.constant 0 : i32
    return %arg0, %c0_i32 : i32, i32
  }
  func.func @transform_5(%arg0: i32) -> (i32, i32) {
    %c0_i32 = arith.constant 0 : i32
    %c0_i32_0 = arith.constant 0 : i32
    return %arg0, %c0_i32 : i32, i32
  }
}

</mosaic_0001>

<bundles_post_ra>
// kernel: tpu_custom_call.1
= control target key start
LH: loop header
LB: loop body
LE: loop exit
PB: predicated region body
PF: predicated region fallthrough
CT: control target
= control target key end

     0   :  { %11 = vsyncpa [#allocation4], 0  ;;  %v1875_v30 = vmov 1983009808   ;;  %v2834_v32 = vlaneseq  ;;  %v174_v57 = vld [vmem:[#allocation2 + $0x6c] sm:$0xff]  ;;  %vm1299_vm0 = vcmask 23552   ;;  %s2828_s0 = inlined_call_operand.vmem [shape: f32[3,2,768], index: 0, kind: input, shape index: {}]   ;;  %s2829_s1 = inlined_call_operand.vmem [shape: f32[768,3], index: 1, kind: input, shape index: {}]   ;;  %s2830_s2 = inlined_call_operand.vmem [shape: f32[1,3], index: 2, kind: input, shape index: {}]   ;;  %s2831_s3 = inlined_call_operand.vmem [shape: s32[2,1], index: 3, kind: input, shape index: {}]   ;;  %s2832_s4 = inlined_call_operand.hbm [shape: f32[2,3], index: 4, kind: output, shape index: {0}]   ;;  %s2833_s5 = inlined_call_operand.vmem [shape: f32[2,1], index: 5, kind: output, shape index: {1}]  }
   0x1   :  { %v1914_v0 = vld [vmem:[%s2829_s1 + $0xf8] sm:$0xff]  ;;  %v1936_v4 = vld [vmem:[%s2829_s1 + $0xf0] sm:$0xff]  ;;  %v1960_v8 = vld [vmem:[%s2829_s1 + $0xe8] sm:$0xff]  ;;  %v209_v31 = vunpack.c.l.s4 %v1875_v30  ;;  %vm1350_vm3 = vcmask 7168  }
   0x2   :  { %2952 = vst [vmem:[#allocation7_spill] sm:$0xff] %v1914_v0  ;;  %v1919_v1 = vld [vmem:[%s2829_s1 + $0x1f8] sm:$0xff]  ;;  %1424 = vmatprep.subr.mxu0 %v1914_v0  ;;  %2954 = vst [vmem:[#allocation9_spill] sm:$0xff] %v1936_v4  ;;  %v1943_v5 = vld [vmem:[%s2829_s1 + $0x1f0] sm:$0xff]  ;;  %v212_v42 = vshrl.u32 %v2834_v32, 7 }
   0x3   :  { %1462 = vmatprep.subr.mxu1 %v1919_v1  ;;  %v1926_v2 = vld [vmem:[%s2829_s1 + $0x78] sm:$0xff]  ;;  %v1948_v6 = vld [vmem:[%s2829_s1 + $0x70] sm:$0xff]  ;;  %2956 = vst [vmem:[#allocation11_spill] sm:$0xff] %v1960_v8  ;;  %v1965_v9 = vld [vmem:[%s2829_s1 + $0x1e8] sm:$0xff]  ;;  %v210_v41 = vunpack.c.0.s8 %v209_v31 }
   0x4   :  { %2953 = vst [vmem:[#allocation8_spill] sm:$0xff] %v1926_v2  ;;  %v1931_v3 = vld [vmem:[%s2829_s1 + $0x178] sm:$0xff]  ;;  %1425 = vmatpush3.msra.mxu0 %v1926_v2  ;;  %2955 = vst [vmem:[#allocation10_spill] sm:$0xff] %v1948_v6  ;;  %v1953_v7 = vld [vmem:[%s2829_s1 + $0x170] sm:$0xff] }
   0x5   :  { %1463 = vmatpush3.msra.mxu1 %v1931_v3  ;;  %1426 = vmatprep.subr.mxu0 %v1936_v4  ;;  %v1970_v10 = vld [vmem:[%s2829_s1 + $0x68] sm:$0xff]  ;;  %v1982_v12 = vld [vmem:[%s2829_s1 + $0xe0] sm:$0xff]  ;;  %v2006_v16 = vld [vmem:[%s2829_s1 + $0xd8] sm:$0xff]  ;;  %v2197_v54 = vsub.s32 %v210_v41, %v212_v42 }
   0x6   :  { %1464 = vmatprep.subr.mxu1 %v1943_v5  ;;  %2957 = vst [vmem:[#allocation12_spill] sm:$0xff] %v1970_v10  ;;  %1427 = vmatpush3.msra.mxu0 %v1948_v6  ;;  %v1977_v11 = vld [vmem:[%s2829_s1 + $0x168] sm:$0xff]  ;;  %2958 = vst [vmem:[#allocation13_spill] sm:$0xff] %v1982_v12  ;;  %v1987_v13 = vld [vmem:[%s2829_s1 + $0x1e0] sm:$0xff] }
   0x7   :  { %1465 = vmatpush3.msra.mxu1 %v1953_v7  ;;  %1428 = vmatprep.subr.mxu0 %v1960_v8  ;;  %v1994_v14 = vld [vmem:[%s2829_s1 + $0x60] sm:$0xff]  ;;  %2960 = vst [vmem:[#allocation15_spill] sm:$0xff] %v2006_v16  ;;  %v2011_v17 = vld [vmem:[%s2829_s1 + $0x1d8] sm:$0xff]  ;;  %v2030_v20 = vld [vmem:[%s2829_s1 + $0xd0] sm:$0xff] }
   0x8   :  { %1466 = vmatprep.subr.mxu1 %v1965_v9  ;;  %2959 = vst [vmem:[#allocation14_spill] sm:$0xff] %v1994_v14  ;;  %v1999_v15 = vld [vmem:[%s2829_s1 + $0x160] sm:$0xff]  ;;  %1429 = vmatpush3.msra.mxu0 %v1970_v10  ;;  %v2018_v18 = vld [vmem:[%s2829_s1 + $0x58] sm:$0xff]  ;;  %2962 = vst [vmem:[#allocation17_spill] sm:$0xff] %v2030_v20 }
   0x9   :  { %1467 = vmatpush3.msra.mxu1 %v1977_v11  ;;  %1430 = vmatprep.subr.mxu0 %v1982_v12  ;;  %2961 = vst [vmem:[#allocation16_spill] sm:$0xff] %v2018_v18  ;;  %v2023_v19 = vld [vmem:[%s2829_s1 + $0x158] sm:$0xff]  ;;  %v2035_v21 = vld [vmem:[%s2829_s1 + $0x1d0] sm:$0xff]  ;;  %v2054_v24 = vld [vmem:[%s2829_s1 + $0xc8] sm:$0xff] }
   0xa   :  { %1468 = vmatprep.subr.mxu1 %v1987_v13  ;;  %1431 = vmatpush3.msra.mxu0 %v1994_v14  ;;  %v2042_v22 = vld [vmem:[%s2829_s1 + $0x50] sm:$0xff]  ;;  %2964 = vst [vmem:[#allocation19_spill] sm:$0xff] %v2054_v24  ;;  %v2059_v25 = vld [vmem:[%s2829_s1 + $0x1c8] sm:$0xff]  ;;  %v2078_v28 = vld [vmem:[%s2829_s1 + $0xc0] sm:$0xff] }
   0xb   :  { %1469 = vmatpush3.msra.mxu1 %v1999_v15  ;;  %1432 = vmatprep.subr.mxu0 %v2006_v16  ;;  %2963 = vst [vmem:[#allocation18_spill] sm:$0xff] %v2042_v22  ;;  %v2047_v23 = vld [vmem:[%s2829_s1 + $0x150] sm:$0xff]  ;;  %v2066_v26 = vld [vmem:[%s2829_s1 + $0x48] sm:$0xff]  ;;  %2966 = vst [vmem:[#allocation21_spill] sm:$0xff] %v2078_v28 }
   0xc   :  { %1470 = vmatprep.subr.mxu1 %v2011_v17  ;;  %1433 = vmatpush3.msra.mxu0 %v2018_v18  ;;  %2965 = vst [vmem:[#allocation20_spill] sm:$0xff] %v2066_v26  ;;  %v2071_v27 = vld [vmem:[%s2829_s1 + $0x148] sm:$0xff]  ;;  %v2083_v29 = vld [vmem:[%s2829_s1 + $0x1c0] sm:$0xff]  ;;  %v2102_v35 = vld [vmem:[%s2829_s1 + $0xb8] sm:$0xff] }
   0xd   :  { %1471 = vmatpush3.msra.mxu1 %v2023_v19  ;;  %1434 = vmatprep.subr.mxu0 %v2030_v20  ;;  %2967 = vst [vmem:[#allocation22_spill] sm:$0xff] %v2083_v29  ;;  %v2090_v33 = vld [vmem:[%s2829_s1 + $0x40] sm:$0xff]  ;;  %2970 = vst [vmem:[#allocation25_spill] sm:$0xff] %v2102_v35  ;;  %v2107_v36 = vld [vmem:[%s2829_s1 + $0x1b8] sm:$0xff] }
   0xe   :  { %1472 = vmatprep.subr.mxu1 %v2035_v21  ;;  %1435 = vmatpush3.msra.mxu0 %v2042_v22  ;;  %2968 = vst [vmem:[#allocation23_spill] sm:$0xff] %v2090_v33  ;;  %v2095_v34 = vld [vmem:[%s2829_s1 + $0x140] sm:$0xff]  ;;  %2971 = vst [vmem:[#allocation26_spill] sm:$0xff] %v2107_v36  ;;  %v2114_v37 = vld [vmem:[%s2829_s1 + $0x38] sm:$0xff] }
   0xf   :  { %1473 = vmatpush3.msra.mxu1 %v2047_v23  ;;  %1436 = vmatprep.subr.mxu0 %v2054_v24  ;;  %2969 = vst [vmem:[#allocation24_spill] sm:$0xff] %v2095_v34  ;;  %2972 = vst [vmem:[#allocation27_spill] sm:$0xff] %v2114_v37  ;;  %v2119_v38 = vld [vmem:[%s2829_s1 + $0x138] sm:$0xff]  ;;  %v2126_v39 = vld [vmem:[%s2829_s1 + $0xb0] sm:$0xff] }
  0x10   :  { %1474 = vmatprep.subr.mxu1 %v2059_v25  ;;  %1437 = vmatpush3.msra.mxu0 %v2066_v26  ;;  %2973 = vst [vmem:[#allocation28_spill] sm:$0xff] %v2119_v38  ;;  %2974 = vst [vmem:[#allocation29_spill] sm:$0xff] %v2126_v39  ;;  %v2131_v40 = vld [vmem:[%s2829_s1 + $0x1b0] sm:$0xff]  ;;  %v2151_v45 = vld [vmem:[%s2829_s1 + $0xa8] sm:$0xff] }
  0x11   :  { %1475 = vmatpush3.msra.mxu1 %v2071_v27  ;;  %1438 = vmatprep.subr.mxu0 %v2078_v28  ;;  %2975 = vst [vmem:[#allocation30_spill] sm:$0xff] %v2131_v40  ;;  %v2139_v43 = vld [vmem:[%s2829_s1 + $0x30] sm:$0xff]  ;;  %2978 = vst [vmem:[#allocation33_spill] sm:$0xff] %v2151_v45  ;;  %v2156_v46 = vld [vmem:[%s2829_s1 + $0x1a8] sm:$0xff] }
  0x12   :  { %1476 = vmatprep.subr.mxu1 %v2083_v29  ;;  %1439 = vmatpush3.msra.mxu0 %v2090_v33  ;;  %2976 = vst [vmem:[#allocation31_spill] sm:$0xff] %v2139_v43  ;;  %v2144_v44 = vld [vmem:[%s2829_s1 + $0x130] sm:$0xff]  ;;  %2979 = vst [vmem:[#allocation34_spill] sm:$0xff] %v2156_v46  ;;  %v2161_v47 = vld [vmem:[%s2829_s1 + $0x28] sm:$0xff] }
  0x13   :  { %1477 = vmatpush3.msra.mxu1 %v2095_v34  ;;  %1440 = vmatprep.subr.mxu0 %v2102_v35  ;;  %2977 = vst [vmem:[#allocation32_spill] sm:$0xff] %v2144_v44  ;;  %2980 = vst [vmem:[#allocation35_spill] sm:$0xff] %v2161_v47  ;;  %v2168_v48 = vld [vmem:[%s2829_s1 + $0x128] sm:$0xff]  ;;  %v2173_v49 = vld [vmem:[%s2829_s1 + $0xa0] sm:$0xff] }
  0x14   :  { %1478 = vmatprep.subr.mxu1 %v2107_v36  ;;  %1441 = vmatpush3.msra.mxu0 %v2114_v37  ;;  %2981 = vst [vmem:[#allocation36_spill] sm:$0xff] %v2168_v48  ;;  %v2178_v50 = vld [vmem:[%s2829_s1 + $0x1a0] sm:$0xff]  ;;  %v2195_v53 = vld [vmem:[%s2829_s1 + $0x98] sm:$0xff]  ;;  %v30_v56 = vld [vmem:[%s2828_s0 + $0xc] sm:$0xff] }
  0x15   :  { %1479 = vmatpush3.msra.mxu1 %v2119_v38  ;;  %1442 = vmatprep.subr.mxu0 %v2126_v39  ;;  %2982 = vst [vmem:[#allocation37_spill] sm:$0xff] %v2178_v50  ;;  %v2185_v51 = vld [vmem:[%s2829_s1 + $0x20] sm:$0xff]  ;;  %v2204_v55 = vld [vmem:[%s2829_s1 + $0x198] sm:$0xff]  ;;  %v204_v58 = vcombine.low %v30_v56, %v174_v57  ;;  %v205_v60 = vcombine.high %v30_v56, %v174_v57  ;;  %v2228_v30 = vld [vmem:[%s2829_s1 + $0x90] sm:$0xff] }
  0x16   :  { %1480 = vmatprep.subr.mxu1 %v2131_v40  ;;  %1443 = vmatpush3.msra.mxu0 %v2139_v43  ;;  %v2190_v52 = vld [vmem:[%s2829_s1 + $0x120] sm:$0xff]  ;;  %2984 = vst [vmem:[#allocation39_spill] sm:$0xff] %v2204_v55  ;;  %v2216_v61 = vld [vmem:[%s2829_s1 + $0x18] sm:$0xff]  ;;  %2986 = vst [vmem:[#allocation41_spill] sm:$0xff] %v2228_v30 }
  0x17   :  { %1481 = vmatpush3.msra.mxu1 %v2144_v44  ;;  %2983 = vst [vmem:[#allocation38_spill] sm:$0xff] %v2190_v52  ;;  %1444 = vmatprep.subr.mxu0 %v2151_v45  ;;  %v1806_v59 = vld [vmem:[#allocation2 + $0x78] ss:$12 sps:$4 sm:$0xff]   ;;  %v1808_v63 = vld [vmem:[#allocation2 + $0x7c] ss:$12 sps:$4 sm:$0xff]   ;;  %v2233_v31 = vld [vmem:[%s2829_s1 + $0x190] sm:$0xff]  ;;  %v214_v41 = vrot.slane %v204_v58, %v2197_v54  ;;  %v221_v32 = vrot.slane %v205_v60, %v2197_v54 }
  0x18   :  { %1482 = vmatprep.subr.mxu1 %v2156_v46  ;;  %1445 = vmatpush3.msra.mxu0 %v2161_v47  ;;  %v2221_v62 = vld [vmem:[%s2829_s1 + $0x118] sm:$0xff]  ;;  %2987 = vst [vmem:[#allocation42_spill] sm:$0xff] %v2233_v31  ;;  %v228_v42 = vrot.slane %v1806_v59, %v2197_v54  ;;  %v2242_v56 = vld [vmem:[%s2829_s1 + $0x10] sm:$0xff]  ;;  %v235_v58 = vrot.slane %v1808_v63, %v2197_v54  ;;  %v2256_v59 = vld [vmem:[%s2829_s1 + $0x88] sm:$0xff] }
  0x19   :  { %1483 = vmatpush3.msra.mxu1 %v2168_v48  ;;  %1446 = vmatprep.subr.mxu0 %v2173_v49  ;;  %2985 = vst [vmem:[#allocation40_spill] sm:$0xff] %v2221_v62  ;;  %2988 = vst [vmem:[#allocation43_spill] sm:$0xff] %v2242_v56  ;;  %v2247_v57 = vld [vmem:[%s2829_s1 + $0x110] sm:$0xff]  ;;  %v2268_v60 = vld [vmem:[%s2829_s1 + $0x8] sm:$0xff] }
  0x1a   :  { %1484 = vmatprep.subr.mxu1 %v2178_v50  ;;  %1447 = vmatpush3.msra.mxu0 %v2185_v51  ;;  %2989 = vst [vmem:[#allocation44_spill] sm:$0xff] %v2247_v57  ;;  %2990 = vst [vmem:[#allocation45_spill] sm:$0xff] %v2256_v59  ;;  %v2273_v63 = vld [vmem:[%s2829_s1 + $0x108] sm:$0xff]  ;;  %v2292_v50 = vld [vmem:[%s2829_s1] sm:$0xff]  ;;  %v236_v46 = vcombine.low %v214_v41, %v228_v42  ;;  %v238_v44 = vcombine.low %v221_v32, %v235_v58 }
  0x1b   :  { %1485 = vmatpush3.msra.mxu1 %v2190_v52  ;;  %1448 = vmatprep.subr.mxu0 %v2195_v53  ;;  %2992 = vst [vmem:[#allocation47_spill] sm:$0xff] %v2273_v63  ;;  %v237_v52 = vcombine.high %v214_v41, %v228_v42  ;;  %v2299_v48 = vld [vmem:[%s2829_s1 + $0x100] sm:$0xff]  ;;  %v2313_v41 = vld [vmem:[%s2829_s1 + $0x278] sm:$0xff]  ;;  %v2461_v38 = vld [vmem:[%s2829_s1 + $0x228] sm:$0xff] }
  0x1c   :  { %1486 = vmatprep.subr.mxu1 %v2204_v55  ;;  %1449 = vmatpush3.msra.mxu0 %v2216_v61  ;;  %v2261_v55 = vld [vmem:[%s2829_s1 + $0x188] sm:$0xff]  ;;  %2994 = vst [vmem:[#allocation49_spill] sm:$0xff] %v2299_v48  ;;  %v2342_v42 = vld [vmem:[%s2829_s1 + $0x2e0] sm:$0xff]  ;;  %v32_v40 = vld [vmem:[%s2828_s0 + $0x18] sm:$0xff] }
  0x1d   :  { %1487 = vmatpush3.msra.mxu1 %v2221_v62  ;;  %2991 = vst [vmem:[#allocation46_spill] sm:$0xff] %v2261_v55  ;;  %1450 = vmatprep.subr.mxu0 %v2228_v30  ;;  %v2280_v62 = vld [vmem:[%s2829_s1 + $0x80] sm:$0xff]  ;;  %2995 = vst [vmem:[#allocation50_spill] sm:$0xff] %v2342_v42 }
  0x1e   :  { %1488 = vmatprep.subr.mxu1 %v2233_v31  ;;  %1451 = vmatpush3.msra.mxu0 %v2242_v56  ;;  %v2285_v31 = vld [vmem:[%s2829_s1 + $0x180] sm:$0xff]  ;;  %3010 = vst [vmem:[#allocation65_spill] sm:$0xff] %v2461_v38 }
  0x1f   :  { %1489 = vmatpush3.msra.mxu1 %v2247_v57  ;;  %2993 = vst [vmem:[#allocation48_spill] sm:$0xff] %v2285_v31  ;;  %1452 = vmatprep.subr.mxu0 %v2256_v59  ;;  %v239_v57 = vcombine.high %v221_v32, %v235_v58  ;;  %v2318_v32 = vld [vmem:[%s2829_s1 + $0x2f0] sm:$0xff]  ;;  %v2354_v58 = vld [vmem:[%s2829_s1 + $0x260] sm:$0xff] }
  0x20   :  { %1490 = vmatprep.subr.mxu1 %v2261_v55  ;;  %1453 = vmatpush3.msra.mxu0 %v2268_v60  ;;  %v2307_v55 = vld [vmem:[%s2829_s1 + $0x2f8] sm:$0xff]  ;;  %2996 = vst [vmem:[#allocation51_spill] sm:$0xff] %v2354_v58 }
  0x21   :  { %1491 = vmatpush3.msra.mxu1 %v2273_v63  ;;  %1454 = vmatprep.subr.mxu0 %v2280_v62  ;;  %v1814_v63 = vld [vmem:[#allocation2 + $0xac] ss:$12 sps:$4 sm:$0xff]  }
  0x22   :  { %1492 = vmatprep.subr.mxu1 %v2285_v31  ;;  %1455 = vmatpush3.msra.mxu0 %v2292_v50  ;;  %v1811_v31 = vld [vmem:[#allocation2 + $0xa8] ss:$12 sps:$4 sm:$0xff]   ;;  %v1832_v34 = vld [vmem:[#allocation2 + $0xd8] ss:$12 sps:$4 sm:$0xff]   ;;  %v289_v29 = vrot.slane %v1814_v63, %v2197_v54  ;;  %v2491_v63 = vld [vmem:[#allocation2 + $0xc] sm:$0xff] }
  0x23   :  { %388 = vmatprep.mubr.f32.mxu0 %v237_v52  ;;  %1493 = vmatpush3.msra.mxu1 %v2299_v48  ;;  %v2325_v52 = vld [vmem:[%s2829_s1 + $0x270] sm:$0xff]  ;;  %v2423_v48 = vld [vmem:[%s2829_s1 + $0x2b8] sm:$0xff] }
  0x24   :  { %463 = vmatprep.mubr.f32.mxu1 %v239_v57  ;;  %389 = vmatmul.mubr.f32.vlgmr.msra.gmra.mxu0 %v236_v46  ;;  %v2337_v46 = vld [vmem:[%s2829_s1 + $0x268] sm:$0xff]  ;;  %v1419_v57 = vld [vmem:[%s2828_s0 + $0x14] sm:$0xf]  ;;  %3005 = vst [vmem:[#allocation60_spill] sm:$0xff] %v2423_v48 }
  0x25   :  { %464 = vmatmul.mubr.f32.vlgmr.msra.gmra.mxu1 %v238_v44  ;;  %1500 = vmatprep.subr.mxu0 %v2307_v55  ;;  %v2332_v44 = vld [vmem:[%s2829_s1 + $0x2e8] sm:$0xff]  ;;  %47 = vst [vmem:[#allocation2 + $0x68] sm:$0xf] %v1419_v57  ;;  %v2373_v57 = vld [vmem:[%s2829_s1 + $0x258] sm:$0xff] }
  0x26   :  { %1538 = vmatprep.subr.mxu1 %v1914_v0  ;;  %1501 = vmatpush3.msra.mxu0 %v2313_v41  ;;  %2998 = vst [vmem:[#allocation53_spill] sm:$0xff] %v2373_v57  ;;  %v1809_v0 = vld [vmem:[#allocation2 + $0x90] ss:$12 sps:$4 sm:$0xff]  }
  0x27   :  { %1539 = vmatpush3.msra.mxu1 %v1926_v2  ;;  %1502 = vmatprep.subr.mxu0 %v2318_v32  ;;  %v2359_v2 = vld [vmem:[%s2828_s0] sm:$0xff]  ;;  %v268_v36 = vrot.slane %v1809_v0, %v2197_v54 }
  0x28   :  { %1540 = vmatprep.subr.mxu1 %v1936_v4  ;;  %1503 = vmatpush3.msra.mxu0 %v2325_v52  ;;  %v2366_v4 = vld [vmem:[%s2829_s1 + $0x2d8] sm:$0xff]  ;;  %v2479_v0 = vld [vmem:[%s2829_s1 + $0x220] sm:$0xff] }
  0x29   :  { %1541 = vmatpush3.msra.mxu1 %v1948_v6  ;;  %1504 = vmatprep.subr.mxu0 %v2332_v44  ;;  %2997 = vst [vmem:[#allocation52_spill] sm:$0xff] %v2366_v4  ;;  %v2406_v6 = vld [vmem:[%s2829_s1 + $0x2c0] sm:$0xff]  ;;  %3012 = vst [vmem:[#allocation67_spill] sm:$0xff] %v2479_v0 }
  0x2a   :  { %1542 = vmatprep.subr.mxu1 %v1960_v8  ;;  %1505 = vmatpush3.msra.mxu0 %v2337_v46  ;;  %v2380_v8 = vld [vmem:[%s2829_s1 + $0x2d0] sm:$0xff]  ;;  %3003 = vst [vmem:[#allocation58_spill] sm:$0xff] %v2406_v6 }
  0x2b   :  { %1543 = vmatpush3.msra.mxu1 %v1970_v10  ;;  %1506 = vmatprep.subr.mxu0 %v2342_v42  ;;  %2999 = vst [vmem:[#allocation54_spill] sm:$0xff] %v2380_v8  ;;  %v2387_v10 = vld [vmem:[%s2829_s1 + $0x250] sm:$0xff] }
  0x2c   :  { %1544 = vmatprep.subr.mxu1 %v1982_v12  ;;  %1507 = vmatpush3.msra.mxu0 %v2354_v58  ;;  %3000 = vst [vmem:[#allocation55_spill] sm:$0xff] %v2387_v10  ;;  %v2394_v12 = vld [vmem:[%s2829_s1 + $0x2c8] sm:$0xff] }
  0x2d   :  { %1545 = vmatpush3.msra.mxu1 %v1994_v14  ;;  %1508 = vmatprep.subr.mxu0 %v2366_v4  ;;  %3001 = vst [vmem:[#allocation56_spill] sm:$0xff] %v2394_v12  ;;  %v2401_v14 = vld [vmem:[%s2829_s1 + $0x248] sm:$0xff] }
  0x2e   :  { %1546 = vmatprep.subr.mxu1 %v2006_v16  ;;  %1509 = vmatpush3.msra.mxu0 %v2373_v57  ;;  %3002 = vst [vmem:[#allocation57_spill] sm:$0xff] %v2401_v14  ;;  %v1418_v16 = vld [vmem:[%s2828_s0 + $0x8] sm:$0xf] }
  0x2f   :  { %1547 = vmatpush3.msra.mxu1 %v2018_v18  ;;  %1510 = vmatprep.subr.mxu0 %v2380_v8  ;;  %v2416_v18 = vld [vmem:[%s2829_s1 + $0x240] sm:$0xff]  ;;  %45 = vst [vmem:[#allocation2 + $0x8] sm:$0xf] %v1418_v16 }
  0x30   :  { %1548 = vmatprep.subr.mxu1 %v2030_v20  ;;  %3004 = vst [vmem:[#allocation59_spill] sm:$0xff] %v2416_v18  ;;  %1511 = vmatpush3.msra.mxu0 %v2387_v10  ;;  %v2430_v20 = vld [vmem:[%s2829_s1 + $0x238] sm:$0xff]  ;;  %v1813_v16 = vld [vmem:[#allocation2 + $0x94] ss:$12 sps:$4 sm:$0xff]  }
  0x31   :  { %1549 = vmatpush3.msra.mxu1 %v2042_v22  ;;  %1512 = vmatprep.subr.mxu0 %v2394_v12  ;;  %3006 = vst [vmem:[#allocation61_spill] sm:$0xff] %v2430_v20  ;;  %v2439_v22 = vld [vmem:[%s2829_s1 + $0x2b0] sm:$0xff] }
  0x32   :  { %1550 = vmatprep.subr.mxu1 %v2054_v24  ;;  %1513 = vmatpush3.msra.mxu0 %v2401_v14  ;;  %3007 = vst [vmem:[#allocation62_spill] sm:$0xff] %v2439_v22  ;;  %v2444_v24 = vld [vmem:[%s2829_s1 + $0x230] sm:$0xff] }
  0x33   :  { %1551 = vmatpush3.msra.mxu1 %v2066_v26  ;;  %1514 = vmatprep.subr.mxu0 %v2406_v6  ;;  %3008 = vst [vmem:[#allocation63_spill] sm:$0xff] %v2444_v24  ;;  %v913_v26 = vld [vmem:[#allocation2 + $0xcc] sm:$0xff]  ;;  %v1834_v6 = vld [vmem:[#allocation2 + $0xdc] ss:$12 sps:$4 sm:$0xff]  }
  0x34   :  { %1552 = vmatprep.subr.mxu1 %v2078_v28  ;;  %1515 = vmatpush3.msra.mxu0 %v2416_v18  ;;  %v2454_v28 = vld [vmem:[%s2829_s1 + $0x2a8] sm:$0xff]  ;;  %v282_v18 = vrot.slane %v1811_v31, %v2197_v54  ;;  %v944_v14 = vcombine.high %v32_v40, %v913_v26 }
  0x35   :  { %1553 = vmatpush3.msra.mxu1 %v2090_v33  ;;  %3009 = vst [vmem:[#allocation64_spill] sm:$0xff] %v2454_v28  ;;  %1516 = vmatprep.subr.mxu0 %v2423_v48  ;;  %v943_v33 = vcombine.low %v32_v40, %v913_v26  ;;  %v275_v48 = vrot.slane %v1813_v16, %v2197_v54  ;;  %v2489_v26 = vld [vmem:[%s2829_s1 + $0x298] sm:$0xff]  ;;  %v1816_v40 = vld [vmem:[#allocation2 + $0x80] ss:$12 sps:$4 sm:$0xff]  }
  0x36   :  { %1554 = vmatprep.subr.mxu1 %v2102_v35  ;;  %1517 = vmatpush3.msra.mxu0 %v2430_v20  ;;  %v2470_v35 = vld [vmem:[%s2829_s1 + $0x2a0] sm:$0xff]  ;;  %3014 = vst [vmem:[#allocation69_spill] sm:$0xff] %v2489_v26  ;;  %v2494_v16 = vrot.slane %v1832_v34, %v2197_v54 }
  0x37   :  { %1555 = vmatpush3.msra.mxu1 %v2114_v37  ;;  %3011 = vst [vmem:[#allocation66_spill] sm:$0xff] %v2470_v35  ;;  %1518 = vmatprep.subr.mxu0 %v2439_v22  ;;  %v2482_v31 = vrot.slane %v943_v33, %v2197_v54  ;;  %v2504_v33 = vld [vmem:[%s2829_s1 + $0x218] sm:$0xff]  ;;  %v1420_v34 = vld [vmem:[%s2828_s0 + $0x20] sm:$0xf]  ;;  %v293_v37 = vcombine.high %v275_v48, %v289_v29 }
  0x38   :  { %1556 = vmatprep.subr.mxu1 %v2126_v39  ;;  %1519 = vmatpush3.msra.mxu0 %v2444_v24  ;;  %3015 = vst [vmem:[#allocation70_spill] sm:$0xff] %v2494_v16  ;;  %v2497_v39 = vrot.slane %v944_v14, %v2197_v54  ;;  %3017 = vst [vmem:[#allocation72_spill] sm:$0xff] %v2504_v33  ;;  %v291_v14 = vcombine.high %v268_v36, %v282_v18 }
  0x39   :  { %3013 = vst [vmem:[#allocation68_spill] sm:$0xff] %v2482_v31  ;;  %1557 = vmatpush3.msra.mxu1 %v2139_v43  ;;  %1520 = vmatprep.subr.mxu0 %v2454_v28  ;;  %v2507_v43 = vrot.slane %v1834_v6, %v2197_v54  ;;  %v1815_v28 = vld [vmem:[#allocation2 + $0x68] ss:$12 sps:$4 sm:$0xff]   ;;  %49 = vst [vmem:[#allocation2 + $0xc8] sm:$0xf] %v1420_v34  ;;  %v565_v34 = vcombine.low %v2359_v2, %v2491_v63 }
  0x3a   :  { %3016 = vst [vmem:[#allocation71_spill] sm:$0xff] %v2497_v39  ;;  %1558 = vmatprep.subr.mxu1 %v2151_v45  ;;  %1521 = vmatpush3.msra.mxu0 %v2461_v38  ;;  %v1817_v45 = vld [vmem:[#allocation2 + $0x18] ss:$12 sps:$4 sm:$0xff]   ;;  %v2533_v6 = vld [vmem:[%s2829_s1 + $0x290] sm:$0xff]  ;;  %v290_v24 = vcombine.low %v268_v36, %v282_v18  ;;  %v292_v16 = vcombine.low %v275_v48, %v289_v29  ;;  %v2549_v18 = vld [vmem:[%s2829_s1 + $0x288] sm:$0xff] }
  0x3b   :  { %3018 = vst [vmem:[#allocation73_spill] sm:$0xff] %v2507_v43  ;;  %1559 = vmatpush3.msra.mxu1 %v2161_v47  ;;  %1522 = vmatprep.subr.mxu0 %v2470_v35  ;;  %3019 = vst [vmem:[#allocation74_spill] sm:$0xff] %v2533_v6  ;;  %v248_v47 = vrot.slane %v1815_v28, %v2197_v54  ;;  %v255_v43 = vrot.slane %v1816_v40, %v2197_v54  ;;  %v2542_v39 = vld [vmem:[%s2829_s1 + $0x210] sm:$0xff]  ;;  %v1819_v36 = vld [vmem:[#allocation2 + $0x98] ss:$12 sps:$4 sm:$0xff]  }
  0x3c   :  { %1560 = vmatprep.subr.mxu1 %v2173_v49  ;;  %1523 = vmatpush3.msra.mxu0 %v2479_v0  ;;  %3020 = vst [vmem:[#allocation75_spill] sm:$0xff] %v2542_v39  ;;  %v575_v28 = vrot.slane %v565_v34, %v2197_v54  ;;  %v589_v29 = vrot.slane %v1817_v45, %v2197_v54  ;;  %v2556_v48 = vld [vmem:[%s2829_s1 + $0x208] sm:$0xff]  ;;  %v2563_v40 = vld [vmem:[%s2829_s1 + $0x280] sm:$0xff] }
  0x3d   :  { %1561 = vmatpush3.msra.mxu1 %v2185_v51  ;;  %1524 = vmatprep.subr.mxu0 %v2489_v26  ;;  %3021 = vst [vmem:[#allocation76_spill] sm:$0xff] %v2556_v48  ;;  %3022 = vst [vmem:[#allocation77_spill] sm:$0xff] %v2563_v40  ;;  %v256_v45 = vcombine.low %v248_v47, %v255_v43  ;;  %v1823_v34 = vld [vmem:[#allocation2 + $0x48] ss:$12 sps:$4 sm:$0xff]  }
  0x3e   :  { %1562 = vmatprep.subr.mxu1 %v2195_v53  ;;  %1525 = vmatpush3.msra.mxu0 %v2504_v33  ;;  %v598_v31 = vcombine.high %v575_v28, %v589_v29 }
  0x3f   :  { %1563 = vmatpush3.msra.mxu1 %v2216_v61  ;;  %393 = vmatprep.mubr.f32.mxu0 %v291_v14  ;;  %v257_v14 = vcombine.high %v248_v47, %v255_v43  ;;  %v643_v47 = vrot.slane %v1823_v34, %v2197_v54  ;;  %v3030_v34 = vld [vmem:[#allocation28_spill] sm:$0xff] }
  0x40   :  { %468 = vmatprep.mubr.f32.mxu1 %v293_v37  ;;  %1526 = vmatprep.subr.mxu0 %v2533_v6  ;;  %v1820_v37 = vld [vmem:[#allocation2 + $0xb0] ss:$12 sps:$4 sm:$0xff]  }
  0x41   :  { %1564 = vmatprep.subr.mxu1 %v2228_v30  ;;  %394 = vmatmul.mubr.f32.gmra.mxu0 %v290_v24  ;;  %v2570_v24 = vld [vmem:[%s2829_s1 + $0x200] sm:$0xff]  ;;  %v309_v30 = vrot.slane %v1820_v37, %v2197_v54 }
  0x42   :  { %469 = vmatmul.mubr.f32.gmra.mxu1 %v292_v16  ;;  %1527 = vmatpush3.msra.mxu0 %v2542_v39  ;;  %v1821_v16 = vld [vmem:[#allocation2 + $0x30] ss:$12 sps:$4 sm:$0xff]  }
  0x43   :  { %1565 = vmatpush3.msra.mxu1 %v2242_v56  ;;  %1528 = vmatprep.subr.mxu0 %v2549_v18  ;;  %v302_v56 = vrot.slane %v1819_v36, %v2197_v54  ;;  %v629_v43 = vrot.slane %v1821_v16, %v2197_v54  ;;  %v3029_v16 = vld [vmem:[#allocation60_spill] sm:$0xff] }
  0x44   :  { %1566 = vmatprep.subr.mxu1 %v2256_v59  ;;  %1529 = vmatpush3.msra.mxu0 %v2556_v48  ;;  %v597_v59 = vcombine.low %v575_v28, %v589_v29  ;;  %v3026_v29 = vld [vmem:[#allocation24_spill] sm:$0xff] }
  0x45   :  { %1567 = vmatpush3.msra.mxu1 %v2268_v60  ;;  %1530 = vmatprep.subr.mxu0 %v2563_v40  ;;  %v311_v36 = vcombine.high %v302_v56, %v309_v30  ;;  %v310_v37 = vcombine.low %v302_v56, %v309_v30  ;;  %v652_v28 = vcombine.high %v629_v43, %v643_v47  ;;  %v3023_v30 = vld [vmem:[#allocation57_spill] sm:$0xff]  ;;  %v3024_v56 = vld [vmem:[#allocation22_spill] sm:$0xff] }
  0x46   :  { %1568 = vmatprep.subr.mxu1 %v2280_v62  ;;  %1531 = vmatpush3.msra.mxu0 %v2570_v24 }
  0x47   :  { %538 = vmatprep.mubr.f32.mxu0 %v257_v14  ;;  %1569 = vmatpush3.msra.mxu1 %v2292_v50  ;;  %v3027_v14 = vld [vmem:[#allocation59_spill] sm:$0xff] }
  0x48   :  { %539 = vmatmul.mubr.f32.vlgmr.msra.gmra.mxu0 %v256_v45  ;;  %749 = vmatprep.mubr.f32.mxu1 %v598_v31  ;;  %v651_v31 = vcombine.low %v629_v43, %v643_v47  ;;  %v3028_v45 = vld [vmem:[#allocation26_spill] sm:$0xff]  ;;  %v3032_v47 = vld [vmem:[#allocation32_spill] sm:$0xff] }
  0x49   :  { %1576 = vmatprep.subr.mxu0 %v1919_v1  ;;  %1614 = vmatprep.subr.mxu1 %v2307_v55  ;;  %v3031_v43 = vld [vmem:[#allocation30_spill] sm:$0xff] }
  0x4a   :  { %750 = vmatmul.mubr.f32.vlgmr.msra.gmra.mxu1 %v597_v59  ;;  %1577 = vmatpush3.msra.mxu0 %v1931_v3  ;;  %v3025_v59 = vld [vmem:[#allocation58_spill] sm:$0xff] }
  0x4b   :  { %1615 = vmatpush3.msra.mxu1 %v2313_v41  ;;  %1578 = vmatprep.subr.mxu0 %v1943_v5 }
  0x4c   :  { %1616 = vmatprep.subr.mxu1 %v2318_v32  ;;  %543 = vmatprep.mubr.f32.mxu0 %v311_v36  ;;  %v3033_v36 = vld [vmem:[#allocation63_spill] sm:$0xff] }
  0x4d   :  { %1579 = vmatpush3.msra.mxu0 %v1953_v7  ;;  %1617 = vmatpush3.msra.mxu1 %v2325_v52 }
  0x4e   :  { %544 = vmatmul.mubr.f32.gmra.mxu0 %v310_v37  ;;  %1580 = vmatprep.subr.mxu0 %v1965_v9  ;;  %v566_v37 = vcombine.high %v2359_v2, %v2491_v63 }
  0x4f   :  { %1618 = vmatprep.subr.mxu1 %v2332_v44  ;;  %754 = vmatprep.mubr.f32.mxu1 %v652_v28  ;;  %v1825_v28 = vld [vmem:[#allocation2 + $0x1c] ss:$12 sps:$4 sm:$0xff]  }
  0x50   :  { %1581 = vmatpush3.msra.mxu0 %v1977_v11  ;;  %1619 = vmatpush3.msra.mxu1 %v2337_v46  ;;  %v582_v2 = vrot.slane %v566_v37, %v2197_v54  ;;  %v596_v63 = vrot.slane %v1825_v28, %v2197_v54  ;;  %v3042_v37 = vld [vmem:[#allocation44_spill] sm:$0xff] }
  0x51   :  { %1582 = vmatprep.subr.mxu0 %v1987_v13  ;;  %755 = vmatmul.mubr.f32.gmra.mxu1 %v651_v31  ;;  %v3034_v31 = vld [vmem:[#allocation34_spill] sm:$0xff] }
  0x52   :  { %1620 = vmatprep.subr.mxu1 %v2342_v42  ;;  %1583 = vmatpush3.msra.mxu0 %v1999_v15  ;;  %v600_v28 = vcombine.high %v582_v2, %v596_v63  ;;  %v3046_v42 = vld [vmem:[#allocation49_spill] sm:$0xff] }
  0x53   :  { %1621 = vmatpush3.msra.mxu1 %v2354_v58  ;;  %1584 = vmatprep.subr.mxu0 %v2011_v17  ;;  %v3045_v58 = vld [vmem:[#allocation48_spill] sm:$0xff] }
  0x54   :  { %1622 = vmatprep.subr.mxu1 %v2366_v4  ;;  %1585 = vmatpush3.msra.mxu0 %v2023_v19 }
  0x55   :  { %1623 = vmatpush3.msra.mxu1 %v2373_v57  ;;  %1586 = vmatprep.subr.mxu0 %v2035_v21  ;;  %v3044_v57 = vld [vmem:[#allocation47_spill] sm:$0xff] }
  0x56   :  { %1624 = vmatprep.subr.mxu1 %v2380_v8  ;;  %1587 = vmatpush3.msra.mxu0 %v2047_v23  ;;  %v3041_v8 = vld [vmem:[#allocation42_spill] sm:$0xff] }
  0x57   :  { %1625 = vmatpush3.msra.mxu1 %v2387_v10  ;;  %1588 = vmatprep.subr.mxu0 %v2059_v25  ;;  %v1829_v10 = vld [vmem:[#allocation2 + $0x4c] ss:$12 sps:$4 sm:$0xff]  }
  0x58   :  { %1626 = vmatprep.subr.mxu1 %v2394_v12  ;;  %1589 = vmatpush3.msra.mxu0 %v2071_v27  ;;  %v1828_v12 = vld [vmem:[#allocation2 + $0x34] ss:$12 sps:$4 sm:$0xff]  }
  0x59   :  { %1627 = vmatpush3.msra.mxu1 %v3023_v30  ;;  %1590 = vmatprep.subr.mxu0 %v3024_v56  ;;  %v3037_v30 = vld [vmem:[#allocation37_spill] sm:$0xff]  ;;  %v636_v4 = vrot.slane %v1828_v12, %v2197_v54 }
  0x5a   :  { %1628 = vmatprep.subr.mxu1 %v3025_v59  ;;  %1591 = vmatpush3.msra.mxu0 %v3026_v29  ;;  %v1827_v59 = vld [vmem:[#allocation2 + $0x20] ss:$12 sps:$4 sm:$0xff]  }
  0x5b   :  { %1629 = vmatpush3.msra.mxu1 %v3027_v14  ;;  %1592 = vmatprep.subr.mxu0 %v3028_v45  ;;  %v3035_v14 = vld [vmem:[#allocation64_spill] sm:$0xff] }
  0x5c   :  { %1630 = vmatprep.subr.mxu1 %v3029_v16  ;;  %1593 = vmatpush3.msra.mxu0 %v3030_v34  ;;  %v3036_v16 = vld [vmem:[#allocation36_spill] sm:$0xff] }
  0x5d   :  { %1631 = vmatpush3.msra.mxu1 %v2430_v20  ;;  %1594 = vmatprep.subr.mxu0 %v3031_v43  ;;  %v1826_v20 = vld [vmem:[#allocation2 + $0x8] ss:$12 sps:$4 sm:$0xff]  }
  0x5e   :  { %1632 = vmatprep.subr.mxu1 %v2439_v22  ;;  %1595 = vmatpush3.msra.mxu0 %v3032_v47  ;;  %v3038_v22 = vld [vmem:[#allocation38_spill] sm:$0xff] }
  0x5f   :  { %1633 = vmatpush3.msra.mxu1 %v3033_v36  ;;  %1596 = vmatprep.subr.mxu0 %v3034_v31  ;;  %v3039_v36 = vld [vmem:[#allocation39_spill] sm:$0xff] }
  0x60   :  { %1634 = vmatprep.subr.mxu1 %v3035_v14  ;;  %1597 = vmatpush3.msra.mxu0 %v3036_v16  ;;  %v3040_v14 = vld [vmem:[#allocation40_spill] sm:$0xff] }
  0x61   :  { %1635 = vmatpush3.msra.mxu1 %v2461_v38  ;;  %1598 = vmatprep.subr.mxu0 %v3037_v30  ;;  %v609_v38 = vrot.slane %v1826_v20, %v2197_v54  ;;  %v1831_v20 = vld [vmem:[#allocation2 + $0x50] ss:$12 sps:$4 sm:$0xff]  }
  0x62   :  { %1636 = vmatprep.subr.mxu1 %v2470_v35  ;;  %1599 = vmatpush3.msra.mxu0 %v3038_v22  ;;  %v616_v35 = vrot.slane %v1827_v59, %v2197_v54 }
  0x63   :  { %1637 = vmatpush3.msra.mxu1 %v2479_v0  ;;  %1600 = vmatprep.subr.mxu0 %v3039_v36  ;;  %v1830_v0 = vld [vmem:[#allocation2 + $0x38] ss:$12 sps:$4 sm:$0xff]  }
  0x64   :  { %1638 = vmatprep.subr.mxu1 %v2489_v26  ;;  %1601 = vmatpush3.msra.mxu0 %v3040_v14  ;;  %v3043_v26 = vld [vmem:[#allocation46_spill] sm:$0xff]  ;;  %v618_v59 = vcombine.high %v609_v38, %v616_v35 }
  0x65   :  { %1639 = vmatpush3.msra.mxu1 %v2504_v33  ;;  %1602 = vmatprep.subr.mxu0 %v3041_v8  ;;  %v599_v33 = vcombine.low %v582_v2, %v596_v63  ;;  %v663_v2 = vrot.slane %v1830_v0, %v2197_v54  ;;  %v670_v63 = vrot.slane %v1831_v20, %v2197_v54  ;;  %v3050_v0 = vld [vmem:[#allocation10_spill] sm:$0xff]  ;;  %v3094_v20 = vld [vmem:[#allocation64_spill] sm:$0xff] }
  0x66   :  { %1640 = vmatprep.subr.mxu1 %v2533_v6  ;;  %1603 = vmatpush3.msra.mxu0 %v3042_v37  ;;  %v650_v6 = vrot.slane %v1829_v10, %v2197_v54 }
  0x67   :  { %1641 = vmatpush3.msra.mxu1 %v2542_v39  ;;  %1604 = vmatprep.subr.mxu0 %v3043_v26  ;;  %v617_v39 = vcombine.low %v609_v38, %v616_v35  ;;  %v3049_v35 = vld [vmem:[#allocation9_spill] sm:$0xff]  ;;  %v672_v38 = vcombine.high %v663_v2, %v670_v63 }
  0x68   :  { %1642 = vmatprep.subr.mxu1 %v2549_v18  ;;  %1605 = vmatpush3.msra.mxu0 %v3044_v57  ;;  %v654_v12 = vcombine.high %v636_v4, %v650_v6  ;;  %v653_v10 = vcombine.low %v636_v4, %v650_v6  ;;  %v3054_v4 = vld [vmem:[#allocation14_spill] sm:$0xff]  ;;  %v3068_v6 = vld [vmem:[#allocation35_spill] sm:$0xff] }
  0x69   :  { %1643 = vmatpush3.msra.mxu1 %v2556_v48  ;;  %1606 = vmatprep.subr.mxu0 %v3045_v58  ;;  %v3047_v48 = vld [vmem:[#allocation7_spill] sm:$0xff] }
  0x6a   :  { %1644 = vmatprep.subr.mxu1 %v2563_v40  ;;  %1607 = vmatpush3.msra.mxu0 %v3046_v42  ;;  %v3048_v40 = vld [vmem:[#allocation8_spill] sm:$0xff] }
  0x6b   :  { %824 = vmatprep.mubr.f32.mxu0 %v600_v28  ;;  %1645 = vmatpush3.msra.mxu1 %v2570_v24  ;;  %v3093_v28 = vld [vmem:[#allocation63_spill] sm:$0xff] }
  0x6c   :  { %825 = vmatmul.mubr.f32.vlgmr.msra.gmra.mxu0 %v599_v33  ;;  %899 = vmatprep.mubr.f32.mxu1 %v618_v59  ;;  %v671_v33 = vcombine.low %v663_v2, %v670_v63  ;;  %v3095_v59 = vld [vmem:[#allocation65_spill] sm:$0xff] }
  0x6d   :  { %1652 = vmatprep.subr.mxu0 %v3047_v48  ;;  %1690 = vmatprep.subr.mxu1 %v1919_v1  ;;  %v3051_v48 = vld [vmem:[#allocation11_spill] sm:$0xff]  ;;  %v3052_v1 = vld [vmem:[#allocation12_spill] sm:$0xff] }
  0x6e   :  { %900 = vmatmul.mubr.f32.vlgmr.msra.gmra.mxu1 %v617_v39  ;;  %1653 = vmatpush3.msra.mxu0 %v3048_v40  ;;  %v3067_v39 = vld [vmem:[#allocation33_spill] sm:$0xff] }
  0x6f   :  { %1691 = vmatpush3.msra.mxu1 %v1931_v3  ;;  %1654 = vmatprep.subr.mxu0 %v3049_v35  ;;  %v3053_v3 = vld [vmem:[#allocation13_spill] sm:$0xff] }
  0x70   :  { %1692 = vmatprep.subr.mxu1 %v1943_v5  ;;  %829 = vmatprep.mubr.f32.mxu0 %v654_v12  ;;  %v3055_v5 = vld [vmem:[#allocation15_spill] sm:$0xff]  ;;  %v3069_v40 = vld [vmem:[#allocation41_spill] sm:$0xff] }
  0x71   :  { %1655 = vmatpush3.msra.mxu0 %v3050_v0  ;;  %1693 = vmatpush3.msra.mxu1 %v1953_v7  ;;  %v3056_v7 = vld [vmem:[#allocation16_spill] sm:$0xff]  ;;  %v1844_v0 = vld [vmem:[#allocation2 + $0x110] ss:$12 sps:$4 sm:$0xff]  }
  0x72   :  { %830 = vmatmul.mubr.f32.gmra.mxu0 %v653_v10  ;;  %1656 = vmatprep.subr.mxu0 %v3051_v48  ;;  %v1842_v12 = vld [vmem:[#allocation2 + $0xe0] ss:$12 sps:$4 sm:$0xff]   ;;  %v3096_v10 = vld [vmem:[#allocation66_spill] sm:$0xff]  ;;  %v1841_v35 = vld [vmem:[#allocation2 + $0xc8] ss:$12 sps:$4 sm:$0xff]  }
  0x73   :  { %1694 = vmatprep.subr.mxu1 %v1965_v9  ;;  %904 = vmatprep.mubr.f32.mxu1 %v672_v38  ;;  %v3057_v9 = vld [vmem:[#allocation17_spill] sm:$0xff]  ;;  %v1843_v38 = vld [vmem:[#allocation2 + $0xf8] ss:$12 sps:$4 sm:$0xff]  }
  0x74   :  { %1657 = vmatpush3.msra.mxu0 %v3052_v1  ;;  %1695 = vmatpush3.msra.mxu1 %v1977_v11  ;;  %v3058_v11 = vld [vmem:[#allocation18_spill] sm:$0xff] }
  0x75   :  { %1658 = vmatprep.subr.mxu0 %v3053_v3  ;;  %905 = vmatmul.mubr.f32.gmra.mxu1 %v671_v33  ;;  %v3097_v33 = vld [vmem:[#allocation67_spill] sm:$0xff]  ;;  %v3098_v3 = vld [vmem:[#allocation69_spill] sm:$0xff] }
  0x76   :  { %1696 = vmatprep.subr.mxu1 %v1987_v13  ;;  %1659 = vmatpush3.msra.mxu0 %v3054_v4  ;;  %v3059_v13 = vld [vmem:[#allocation19_spill] sm:$0xff]  ;;  %v994_v4 = vrot.slane %v1842_v12, %v2197_v54 }
  0x77   :  { %1697 = vmatpush3.msra.mxu1 %v1999_v15  ;;  %1660 = vmatprep.subr.mxu0 %v3055_v5  ;;  %v3060_v15 = vld [vmem:[#allocation20_spill] sm:$0xff] }
  0x78   :  { %1698 = vmatprep.subr.mxu1 %v2011_v17  ;;  %1661 = vmatpush3.msra.mxu0 %v3056_v7  ;;  %v3061_v17 = vld [vmem:[#allocation21_spill] sm:$0xff]  ;;  %v3099_v5 = vld [vmem:[#allocation72_spill] sm:$0xff]  ;;  %v987_v7 = vrot.slane %v1841_v35, %v2197_v54 }
  0x79   :  { %1699 = vmatpush3.msra.mxu1 %v2023_v19  ;;  %1662 = vmatprep.subr.mxu0 %v3057_v9  ;;  %v3062_v19 = vld [vmem:[#allocation23_spill] sm:$0xff]  ;;  %v1041_v9 = vrot.slane %v1843_v38, %v2197_v54 }
  0x7a   :  { %1700 = vmatprep.subr.mxu1 %v2035_v21  ;;  %1663 = vmatpush3.msra.mxu0 %v3058_v11  ;;  %v3063_v21 = vld [vmem:[#allocation25_spill] sm:$0xff]  ;;  %v1048_v11 = vrot.slane %v1844_v0, %v2197_v54 }
  0x7b   :  { %1701 = vmatpush3.msra.mxu1 %v2047_v23  ;;  %1664 = vmatprep.subr.mxu0 %v3059_v13  ;;  %v3064_v23 = vld [vmem:[#allocation27_spill] sm:$0xff]  ;;  %v3100_v13 = vld [vmem:[#allocation74_spill] sm:$0xff] }
  0x7c   :  { %1702 = vmatprep.subr.mxu1 %v2059_v25  ;;  %1665 = vmatpush3.msra.mxu0 %v3060_v15  ;;  %v3065_v25 = vld [vmem:[#allocation29_spill] sm:$0xff]  ;;  %v3101_v15 = vld [vmem:[#allocation75_spill] sm:$0xff] }
  0x7d   :  { %1703 = vmatpush3.msra.mxu1 %v2071_v27  ;;  %1666 = vmatprep.subr.mxu0 %v3061_v17  ;;  %v3066_v27 = vld [vmem:[#allocation31_spill] sm:$0xff]  ;;  %v996_v17 = vcombine.high %v987_v7, %v994_v4 }
  0x7e   :  { %1704 = vmatprep.subr.mxu1 %v3024_v56  ;;  %1667 = vmatpush3.msra.mxu0 %v3062_v19  ;;  %v3070_v56 = vld [vmem:[#allocation43_spill] sm:$0xff]  ;;  %v1050_v19 = vcombine.high %v1041_v9, %v1048_v11 }
  0x7f   :  { %1705 = vmatpush3.msra.mxu1 %v3026_v29  ;;  %1668 = vmatprep.subr.mxu0 %v3063_v21  ;;  %v1840_v29 = vld [vmem:[#allocation2 + $0x10c] ss:$12 sps:$4 sm:$0xff]  }
  0x80   :  { %1706 = vmatprep.subr.mxu1 %v3028_v45  ;;  %1669 = vmatpush3.msra.mxu0 %v3064_v23  ;;  %v3089_v45 = vld [vmem:[#allocation59_spill] sm:$0xff]  ;;  %v3102_v21 = vld [vmem:[#allocation76_spill] sm:$0xff]  ;;  %v1049_v23 = vcombine.low %v1041_v9, %v1048_v11 }
  0x81   :  { %1707 = vmatpush3.msra.mxu1 %v3030_v34  ;;  %1670 = vmatprep.subr.mxu0 %v3065_v25  ;;  %v3103_v25 = vld [vmem:[#allocation77_spill] sm:$0xff] }
  0x82   :  { %1708 = vmatprep.subr.mxu1 %v3031_v43  ;;  %1671 = vmatpush3.msra.mxu0 %v3066_v27  ;;  %v3091_v43 = vld [vmem:[#allocation61_spill] sm:$0xff]  ;;  %v1876_v27 = vmov 0  }
  0x83   :  { %1709 = vmatpush3.msra.mxu1 %v3032_v47  ;;  %1672 = vmatprep.subr.mxu0 %v3067_v39  ;;  %v1327_v39 = vld [vmem:[%s2831_s3 + $0x8] sm:$0xff] }
  0x84   :  { %1710 = vmatprep.subr.mxu1 %v3034_v31  ;;  %1673 = vmatpush3.msra.mxu0 %v3068_v6  ;;  %v1028_v31 = vrot.slane %v1840_v29, %v2197_v54 }
  0x85   :  { %1711 = vmatpush3.msra.mxu1 %v3036_v16  ;;  %1674 = vmatprep.subr.mxu0 %v2173_v49  ;;  %v3071_v49 = vld [vmem:[#allocation45_spill] sm:$0xff]  ;;  %v3090_v16 = vld [vmem:[#allocation60_spill] sm:$0xff] }
  0x86   :  { %1712 = vmatprep.subr.mxu1 %v3037_v30  ;;  %1675 = vmatpush3.msra.mxu0 %v2185_v51 }
  0x87   :  { %1713 = vmatpush3.msra.mxu1 %v3038_v22  ;;  %1676 = vmatprep.subr.mxu0 %v2195_v53  ;;  %v3072_v22 = vld [vmem:[#allocation68_spill] sm:$0xff]  ;;  %v3075_v53 = vld [vmem:[#allocation71_spill] sm:$0xff] }
  0x88   :  { %1714 = vmatprep.subr.mxu1 %v3039_v36  ;;  %1677 = vmatpush3.msra.mxu0 %v2216_v61  ;;  %v3076_v61 = vld [vmem:[#allocation73_spill] sm:$0xff] }
  0x89   :  { %1715 = vmatpush3.msra.mxu1 %v3040_v14  ;;  %1678 = vmatprep.subr.mxu0 %v3069_v40  ;;  %v3077_v30 = vcombine.high %v3075_v53, %v3076_v61  ;;  %v3088_v14 = vld [vmem:[#allocation58_spill] sm:$0xff] }
  0x8a   :  { %1716 = vmatprep.subr.mxu1 %v3041_v8  ;;  %1679 = vmatpush3.msra.mxu0 %v3070_v56  ;;  %v3073_v8 = vld [vmem:[#allocation70_spill] sm:$0xff] }
  0x8b   :  { %1717 = vmatpush3.msra.mxu1 %v3042_v37  ;;  %1680 = vmatprep.subr.mxu0 %v3071_v49  ;;  %v3074_v51 = vcombine.high %v3072_v22, %v3073_v8  ;;  %v3092_v37 = vld [vmem:[#allocation62_spill] sm:$0xff] }
  0x8c   :  { %1718 = vmatprep.subr.mxu1 %v3043_v26  ;;  %1681 = vmatpush3.msra.mxu0 %v2268_v60  ;;  %v3078_v60 = vcombine.low %v3072_v22, %v3073_v8  ;;  %v1839_v26 = vld [vmem:[#allocation2 + $0xf4] ss:$12 sps:$4 sm:$0xff]  }
  0x8d   :  { %1719 = vmatpush3.msra.mxu1 %v3044_v57  ;;  %1682 = vmatprep.subr.mxu0 %v2280_v62  ;;  %v3079_v62 = vcombine.low %v3075_v53, %v3076_v61  ;;  %v1837_v57 = vld [vmem:[#allocation2 + $0x108] ss:$12 sps:$4 sm:$0xff]   ;;  %v1014_v36 = vrot.slane %v1839_v26, %v2197_v54 }
  0x8e   :  { %1720 = vmatprep.subr.mxu1 %v3045_v58  ;;  %1683 = vmatpush3.msra.mxu0 %v2292_v50  ;;  %v3080_v50 = vld [vmem:[#allocation50_spill] sm:$0xff]  ;;  %v3087_v58 = vld [vmem:[#allocation57_spill] sm:$0xff]  ;;  %v1021_v47 = vrot.slane %v1837_v57, %v2197_v54 }
  0x8f   :  { %1127 = vmatprep.mubr.f32.mxu0 %v3074_v51  ;;  %1721 = vmatpush3.msra.mxu1 %v3046_v42  ;;  %v1835_v42 = vld [vmem:[#allocation2 + $0xf0] ss:$12 sps:$4 sm:$0xff]   ;;  %v1032_v63 = vcombine.high %v1014_v36, %v1028_v31  ;;  %v1031_v1 = vcombine.low %v1014_v36, %v1028_v31 }
  0x90   :  { %1202 = vmatprep.mubr.f32.mxu1 %v3077_v30  ;;  %1128 = vmatmul.mubr.f32.vlgmr.msra.gmra.mxu0 %v3078_v60  ;;  %v1007_v34 = vrot.slane %v1835_v42, %v2197_v54  ;;  %v995_v54 = vcombine.low %v987_v7, %v994_v4 }
  0x91   :  { %1203 = vmatmul.mubr.f32.vlgmr.msra.gmra.mxu1 %v3079_v62  ;;  %1728 = vmatprep.subr.mxu0 %v2307_v55 }
  0x92   :  { %1766 = vmatprep.subr.mxu1 %v2307_v55  ;;  %1729 = vmatpush3.msra.mxu0 %v2313_v41  ;;  %v3081_v55 = vld [vmem:[#allocation51_spill] sm:$0xff]  ;;  %v1030_v2 = vcombine.high %v1007_v34, %v1021_v47  ;;  %v1029_v48 = vcombine.low %v1007_v34, %v1021_v47 }
  0x93   :  { %1782 = vmatpush3.msra.mxu1 %v2313_v41  ;;  %1730 = vmatprep.subr.mxu0 %v2318_v32  ;;  %v3082_v41 = vld [vmem:[#allocation52_spill] sm:$0xff] }
  0x94   :  { %1767 = vmatprep.subr.mxu1 %v2318_v32  ;;  %1731 = vmatpush3.msra.mxu0 %v2325_v52  ;;  %v3083_v32 = vld [vmem:[#allocation53_spill] sm:$0xff] }
  0x95   :  { %1783 = vmatpush3.msra.mxu1 %v2325_v52  ;;  %1732 = vmatprep.subr.mxu0 %v2332_v44  ;;  %v3084_v52 = vld [vmem:[#allocation54_spill] sm:$0xff] }
  0x96   :  { %1768 = vmatprep.subr.mxu1 %v2332_v44  ;;  %1733 = vmatpush3.msra.mxu0 %v2337_v46  ;;  %v3085_v44 = vld [vmem:[#allocation55_spill] sm:$0xff] }
  0x97   :  { %1784 = vmatpush3.msra.mxu1 %v2337_v46  ;;  %1734 = vmatprep.subr.mxu0 %v3080_v50  ;;  %v3086_v46 = vld [vmem:[#allocation56_spill] sm:$0xff] }
  0x98   :  { %1769 = vmatprep.subr.mxu1 %v3080_v50  ;;  %1735 = vmatpush3.msra.mxu0 %v3081_v55 }
  0x99   :  { %1785 = vmatpush3.msra.mxu1 %v3081_v55  ;;  %1736 = vmatprep.subr.mxu0 %v3082_v41 }
  0x9a   :  { %1770 = vmatprep.subr.mxu1 %v3082_v41  ;;  %1737 = vmatpush3.msra.mxu0 %v3083_v32 }
  0x9b   :  { %1786 = vmatpush3.msra.mxu1 %v3083_v32  ;;  %1738 = vmatprep.subr.mxu0 %v3084_v52 }
  0x9c   :  { %1771 = vmatprep.subr.mxu1 %v3084_v52  ;;  %1739 = vmatpush3.msra.mxu0 %v3085_v44 }
  0x9d   :  { %1787 = vmatpush3.msra.mxu1 %v3085_v44  ;;  %1740 = vmatprep.subr.mxu0 %v3086_v46 }
  0x9e   :  { %1772 = vmatprep.subr.mxu1 %v3086_v46  ;;  %1741 = vmatpush3.msra.mxu0 %v3087_v58 }
  0x9f   :  { %1788 = vmatpush3.msra.mxu1 %v3087_v58  ;;  %1742 = vmatprep.subr.mxu0 %v3088_v14 }
  0xa0   :  { %1773 = vmatprep.subr.mxu1 %v3088_v14  ;;  %1743 = vmatpush3.msra.mxu0 %v3089_v45 }
  0xa1   :  { %1789 = vmatpush3.msra.mxu1 %v3089_v45  ;;  %1744 = vmatprep.subr.mxu0 %v3090_v16 }
  0xa2   :  { %1774 = vmatprep.subr.mxu1 %v3090_v16  ;;  %1745 = vmatpush3.msra.mxu0 %v3091_v43 }
  0xa3   :  { %1790 = vmatpush3.msra.mxu1 %v3091_v43  ;;  %1746 = vmatprep.subr.mxu0 %v3092_v37 }
  0xa4   :  { %1775 = vmatprep.subr.mxu1 %v3092_v37  ;;  %1747 = vmatpush3.msra.mxu0 %v3093_v28 }
  0xa5   :  { %1791 = vmatpush3.msra.mxu1 %v3093_v28  ;;  %1748 = vmatprep.subr.mxu0 %v3094_v20 }
  0xa6   :  { %1776 = vmatprep.subr.mxu1 %v3094_v20  ;;  %1749 = vmatpush3.msra.mxu0 %v3095_v59 }
  0xa7   :  { %1792 = vmatpush3.msra.mxu1 %v3095_v59  ;;  %1750 = vmatprep.subr.mxu0 %v3096_v10 }
  0xa8   :  { %1777 = vmatprep.subr.mxu1 %v3096_v10  ;;  %1751 = vmatpush3.msra.mxu0 %v3097_v33 }
  0xa9   :  { %1793 = vmatpush3.msra.mxu1 %v3097_v33  ;;  %1752 = vmatprep.subr.mxu0 %v3098_v3 }
  0xaa   :  { %1778 = vmatprep.subr.mxu1 %v3098_v3  ;;  %1132 = vmatprep.mubr.f32.mxu0 %v1030_v2 }
  0xab   :  { %1207 = vmatprep.mubr.f32.mxu1 %v1032_v63  ;;  %1753 = vmatpush3.msra.mxu0 %v3099_v5 }
  0xac   :  { %1794 = vmatpush3.msra.mxu1 %v3099_v5  ;;  %1133 = vmatmul.mubr.f32.gmra.mxu0 %v1029_v48 }
  0xad   :  { %1208 = vmatmul.mubr.f32.gmra.mxu1 %v1031_v1  ;;  %1754 = vmatprep.subr.mxu0 %v3100_v13 }
  0xae   :  { %1779 = vmatprep.subr.mxu1 %v3100_v13  ;;  %1755 = vmatpush3.msra.mxu0 %v3101_v15 }
  0xaf   :  { %1795 = vmatpush3.msra.mxu1 %v3101_v15  ;;  %1756 = vmatprep.subr.mxu0 %v2549_v18 }
  0xb0   :  { %1780 = vmatprep.subr.mxu1 %v2549_v18  ;;  %1757 = vmatpush3.msra.mxu0 %v3102_v21  ;;  %v1326_v18 = vld [vmem:[%s2831_s3] sm:$0xff] }
  0xb1   :  { %1796 = vmatpush3.msra.mxu1 %v3102_v21  ;;  %1758 = vmatprep.subr.mxu0 %v3103_v25 }
  0xb2   :  { %1781 = vmatprep.subr.mxu1 %v3103_v25  ;;  %1759 = vmatpush3.msra.mxu0 %v2570_v24 }
  0xb3   :  { %1797 = vmatpush3.msra.mxu1 %v2570_v24  ;;  %1277 = vmatprep.mubr.f32.mxu0 %v996_v17 }
  0xb4   :  { %1282 = vmatprep.mubr.f32.mxu1 %v1050_v19  ;;  %1278 = vmatmul.mubr.f32.vlgmr.msra.gmra.mxu0 %v995_v54 }
  0xb5   :  { %1283 = vmatmul.mubr.f32.vlgmr.msra.gmra.mxu1 %v1049_v23  ;;  %1804 = vset.pattern.permute.xlu1 %v1876_v27 }
  0xb6   :  { %1805 = vset.pattern.permute.xlu0 %v1876_v27  ;;  %1329 = vperm.xlu1 %1804, %v1326_v18  }
  0xba   :  { %1332 = vperm.xlu1 %1804, %v1327_v39  }
  0xe4   :  { %v1456_v6 = vpop.f32.mrf.mxu0 }
  0xe5   :  { %v1494_v40 = vpop.f32.mrf.mxu1 }
  0xe6   :  { %v1457_v24 = vpop.f32.mrf.mxu0 }
  0xe7   :  { %v1495_v56 = vpop.f32.mrf.mxu1  ;;  %v1458_v45 = vadd.f32 %v1457_v24, %v1456_v6 }
  0xe8   :  { %v1496_v16 = vadd.f32 %v1495_v56, %v1494_v40 }
  0xea   :  { %v466_v28 = vadd.f32 %v1496_v16, %v1458_v45 }
 0x101   :  { %v1459_v49 = vpop.f32.mrf.mxu0 }
 0x102   :  { %v1497_v22 = vpop.f32.mrf.mxu1 }
 0x103   :  { %v1460_v8 = vpop.f32.mrf.mxu0 }
 0x104   :  { %v1498_v51 = vpop.f32.mrf.mxu1  ;;  %v1461_v34 = vadd.f32 %v1460_v8, %v1459_v49  ;;  %v1421_v49 = vld [vmem:[%s2830_s2] ss:$0 sm:$0xff] }
 0x105   :  { %v1499_v43 = vadd.f32 %v1498_v51, %v1497_v22 }
 0x107   :  { %v471_v20 = vadd.f32 %v1499_v43, %v1461_v34 }
 0x108   :  { %v1532_v53 = vpop.f32.mrf.mxu0 }
 0x10a   :  { %v1570_v61 = vpop.f32.mrf.mxu1  ;;  %v1533_v30 = vpop.f32.mrf.mxu0 }
 0x10b   :  { %v1534_v47 = vadd.f32 %v1533_v30, %v1532_v53 }
 0x10c   :  { %v1571_v60 = vpop.f32.mrf.mxu1 }
 0x10d   :  { %v541_v63 = vadd.f32 %v1534_v47, %v466_v28  ;;  %v1572_v12 = vadd.f32 %v1571_v60, %v1570_v61 }
 0x10e   :  { %v1535_v62 = vpop.f32.mrf.mxu0 }
 0x10f   :  { %v752_v1 = vadd.f32 %v1572_v12, %v541_v63 }
 0x110   :  { %v1536_v55 = vpop.f32.mrf.mxu0 }
 0x111   :  { %v1573_v50 = vpop.f32.mrf.mxu1  ;;  %v1537_v36 = vadd.f32 %v1536_v55, %v1535_v62 }
 0x113   :  { %v1574_v41 = vpop.f32.mrf.mxu1  ;;  %v546_v10 = vadd.f32 %v1537_v36, %v471_v20 }
 0x114   :  { %v1575_v35 = vadd.f32 %v1574_v41, %v1573_v50 }
 0x116   :  { %v757_v3 = vadd.f32 %v1575_v35, %v546_v10 }
 0x12c   :  { %v1608_v32 = vpop.f32.mrf.mxu0 }
 0x12e   :  { %v1646_v52 = vpop.f32.mrf.mxu1  ;;  %v1609_v44 = vpop.f32.mrf.mxu0 }
 0x12f   :  { %v1610_v33 = vadd.f32 %v1609_v44, %v1608_v32  ;;  %v3104_v44 = vlaneseq }
 0x130   :  { %v1647_v46 = vpop.f32.mrf.mxu1 }
 0x131   :  { %v827_v15 = vadd.f32 %v1610_v33, %v752_v1  ;;  %v1648_v17 = vadd.f32 %v1647_v46, %v1646_v52  ;;  %v1330_v52 = vpop.permute.xlu1 %1329  ;;  %v1325_v46 = vand.u32 127, %v3104_v44 }
 0x132   :  { %v1611_v42 = vpop.f32.mrf.mxu0 }
 0x133   :  { %v902_v6 = vadd.f32 %v1648_v17, %v827_v15  ;;  %vm1334_vm1 = vcmp.eq.s32.totalorder %v1325_v46, %v1330_v52 }
 0x134   :  { %v1612_v57 = vpop.f32.mrf.mxu0 }
 0x135   :  { %v1649_v58 = vpop.f32.mrf.mxu1  ;;  %v1613_v48 = vadd.f32 %v1612_v57, %v1611_v42  ;;  %v1333_v42 = vpop.permute.xlu1 %1332 }
 0x136   :  { %vm1335_vm2 = vcmp.eq.s32.totalorder %v1325_v46, %v1333_v42 }
 0x137   :  { %v1650_v26 = vpop.f32.mrf.mxu1  ;;  %v832_v19 = vadd.f32 %v1613_v48, %v757_v3 }
 0x138   :  { %v1651_v21 = vadd.f32 %v1650_v26, %v1649_v58  ;;  %v1877_v58 = vmov 0.0  }
 0x139   :  { %v1422_v57 = vsel %vm1334_vm1, 1.0, %v1877_v58  ;;  %v1423_v45 = vsel %vm1335_vm2, 1.0, %v1877_v58 }
 0x13a   :  { %v907_v40 = vadd.f32 %v1651_v21, %v832_v19 }
 0x150   :  { %v1684_v29 = vpop.f32.mrf.mxu0 }
 0x151   :  { %v1722_v14 = vpop.f32.mrf.mxu1 }
 0x152   :  { %v1685_v31 = vpop.f32.mrf.mxu0 }
 0x153   :  { %v1723_v37 = vpop.f32.mrf.mxu1  ;;  %v1686_v4 = vadd.f32 %v1685_v31, %v1684_v29 }
 0x154   :  { %v1724_v5 = vadd.f32 %v1723_v37, %v1722_v14 }
 0x156   :  { %v1205_v25 = vadd.f32 %v1724_v5, %v1686_v4 }
 0x16c   :  { %v1687_v59 = vpop.f32.mrf.mxu0 }
 0x16d   :  { %v1725_v2 = vpop.f32.mrf.mxu1 }
 0x16e   :  { %v1688_v38 = vpop.f32.mrf.mxu0 }
 0x16f   :  { %v1726_v0 = vpop.f32.mrf.mxu1  ;;  %v1689_v7 = vadd.f32 %v1688_v38, %v1687_v59 }
 0x170   :  { %v1727_v9 = vadd.f32 %v1726_v0, %v1725_v2 }
 0x172   :  { %v1210_v18 = vadd.f32 %v1727_v9, %v1689_v7 }
 0x174   :  { %v1760_v11 = vpop.f32.mrf.mxu0 }
 0x175   :  { %v1763_v13 = vpop.f32.mrf.mxu1 }
 0x176   :  { %v1761_v54 = vpop.f32.mrf.mxu0 }
 0x177   :  { %v1764_v23 = vpop.f32.mrf.mxu1  ;;  %v1762_v27 = vadd.f32 %v1761_v54, %v1760_v11 }
 0x178   :  { %v1765_v39 = vadd.f32 %v1764_v23, %v1763_v13 }
 0x179   :  { %v1280_v24 = vadd.f32 %v1762_v27, %v1205_v25 }
 0x17a   :  { %v1285_v56 = vadd.f32 %v1765_v39, %v1210_v18 }
 0x17b   :  { %v1288_v22 = vadd.f32 %v1280_v24, %v902_v6 }
 0x17c   :  { %v1289_v8 = vadd.f32 %v1285_v56, %v907_v40 }
 0x17d   :  { %v1297_v51 = vadd.f32 %v1421_v49, %v1288_v22 }
 0x17e   :  { %v1298_v53 = vadd.f32 %v1421_v49, %v1289_v8 }
 0x17f   :  { %v1302_v61 = vsel %vm1299_vm0, %v1297_v51, -inf  ;;  %1300 = vst.msk [vmem:[#allocation3] sm:$0xff] %vm1299_vm0, %v1297_v51 }
 0x180   :  { %1301 = vst.msk [vmem:[#allocation3 + $0x8] sm:$0xff] %vm1299_vm0, %v1298_v53  ;;  %1303 = vmax.xlane.f32.xlu0 %v1302_v61  ;;  %v1305_v30 = vsel %vm1299_vm0, %v1298_v53, -inf }
 0x184   :  { %1306 = vmax.xlane.f32.xlu0 %v1305_v30 }
 0x209   :  { %v1304_v60 = vpop.xlane.xlu0 %1303 }
 0x20a   :  { %v1308_v62 = vsub.f32 %v1297_v51, %v1304_v60 }
 0x20c   :  { %v1310_v50 = vmul.f32 1.442695, %v1308_v62  ;;  %v1340_v14 = vmul.f32 %v1422_v57, %v1308_v62 }
 0x20d   :  { %v1307_v55 = vpop.xlane.xlu0 %1306 }
 0x20e   :  { %1845 = vpow2.f32 %v1310_v50  ;;  %v1309_v41 = vsub.f32 %v1298_v53, %v1307_v55  ;;  %v1342_v34 = vsel %vm1299_vm0, %v1340_v14, 0.0 }
 0x210   :  { %v1312_v32 = vmul.f32 1.442695, %v1309_v41  ;;  %v1341_v47 = vmul.f32 %v1423_v45, %v1309_v41 }
 0x212   :  { %1847 = vpow2.f32 %v1312_v32  ;;  %v1345_v36 = vsel %vm1299_vm0, %v1341_v47, 0.0 }
 0x21b   :  { %v1846_v26 = vpop.eup %1845 }
 0x21c   :  { %v1314_v29 = vsel %vm1299_vm0, %v1846_v26, 0.0 }
 0x21d   :  { %1315 = vadd.xlane.f32.xlu0 %v1314_v29 }
 0x21f   :  { %v1848_v16 = vpop.eup %1847 }
 0x220   :  { %v1317_v43 = vsel %vm1299_vm0, %v1848_v16, 0.0 }
 0x221   :  { %1343 = vadd.xlane.f32.xlu0 %v1342_v34  ;;  %1318 = vadd.xlane.f32.xlu1 %v1317_v43 }
 0x225   :  { %1346 = vadd.xlane.f32.xlu0 %v1345_v36 }
 0x2a6   :  { %v1316_v31 = vpop.xlane.xlu0 %1315 }
 0x2a7   :  { %1849 = vlog2.f32 %v1316_v31 }
 0x2aa   :  { %v1319_v37 = vpop.xlane.xlu1 %1318  ;;  %v1344_v20 = vpop.xlane.xlu0 %1343 }
 0x2ab   :  { %1851 = vlog2.f32 %v1319_v37 }
 0x2ae   :  { %v1347_v12 = vpop.xlane.xlu0 %1346 }
 0x2b4   :  { %v1850_v28 = vpop.eup %1849 }
 0x2b5   :  { %v1321_v59 = vmul.f32 0.6931472, %v1850_v28 }
 0x2b7   :  { %v1348_v2 = vsub.f32 %v1321_v59, %v1344_v20 }
 0x2b8   :  { %v1852_v63 = vpop.eup %1851 }
 0x2b9   :  { %1351 = vst.msk [vmem:[#allocation5] sm:$0xff] %vm1350_vm3, %v1348_v2 }
 0x2ba   :  { %1357 = vsyncadd [#allocation4], 224  ;;  %s1878_s2 = smov [#allocation3]  }
 0x2bb   :  { %s1358_s25 = sshll.u32 %s1878_s2, 4  ;;  %s1359_s25 = int_to_ptr.vmem [resolvable:$true] %s1358_s25 }
 0x2bc   :  { %s1853_s28 = scalar_lea.vmem %s1359_s25, 32  ;;  %s1857_s29 = scalar_lea.vmem %s1359_s25, 256 }
 0x2bd   :  { %p1854_p0 = scmp.ne.s32.totalorder %s1359_s25, %s1853_s28  ;;  %p1858_p1 = scmp.lt.s32.totalorder %s1359_s25, %s1359_s25 }
 0x2be   :  { %p1859_p2 = scmp.lt.s32.totalorder %s1857_s29, %s1853_s28 }
 0x2c0   :  { %v1383_v10 = vld [vmem:[#allocation5] sm:$0x3]  ;;  %p1860_p3 = por %p1859_p2, %p1858_p1 }
 0x2c1   :  { %1384 = vst [vmem:[%s2833_s5] sm:$0x3] %v1383_v10 }
 0x2c2   :  { %p1861_p4 = pnand %p1860_p3, %p1854_p0 }
 0x2c4   :  { %1864 = shalt.err (!%p1861_p4)
}
 0x2c5   :  { %s1879_s30 = smov 32   ;;  %s1880_s6 = smov 2  }
 0x2c6   :  { %1364 = dma.vmem_to_hbm [thread:$0]  %s1359_s25, 32, %s2832_s4, [#allocation4], %s1879_s30, %s1879_s30, %s1880_s6  }
 0x2c7   :  { %1873 = dma.done.wait [#allocation4], 256  }
 0x2c8   :  { %1874 = vsyncadd [#allocation4], 4294967040 }
 0x2c9   :  { %1405 = vsyncpa [#allocation4], 1 }

</bundles_post_ra>
